<compile_context>
chip_gen: v5e
topology: v5e:2x2
jax: 0.10.0
libtpu: 0.0.40
codegen_flags: <defaults>
</compile_context>

<pallas_src>
import functools
import math

import jax
import jax.numpy as jnp
from jax import lax
from jax.experimental import pallas as pl
from jax.experimental.pallas import tpu as pltpu


def _round_up(x, m):
    return ((x + m - 1) // m) * m


def _vmem_capacity_bytes():
    try:
        return int(pltpu.get_tpu_info().vmem_capacity_bytes)
    except Exception:
        return 64 * 1024 * 1024  # conservative default (v7x has the smallest VMEM)


def _relpos_kernel(ri_i_ref, ri_j_ref, mask_i_ref, mask_j_ref, emb_ref, out_ref,
                   *, bins, chunk_i):
    """One (batch b, row-tile i, col-tile j) output block.

    ri_i_ref / mask_i_ref : (1, TI, 1) int32   row-side residue indices / mask
    ri_j_ref / mask_j_ref : (1, 1, TJ) int32   col-side residue indices / mask
    emb_ref               : (Vp, D)            zero-padded embedding table (resident)
    out_ref               : (1, TI, TJ, D)     output tile
    """
    TI = out_ref.shape[1]
    TJ = out_ref.shape[2]
    Vp, D = emb_ref.shape

    # Column-side values and the table: loaded once per output tile.
    ri_j = ri_j_ref[0]                                   # (1, TJ) int32
    m_j = mask_j_ref[0]                                  # (1, TJ) int32
    emb = emb_ref[...]                                   # (Vp, D)

    # Hoisted tiny iota; the `==` below broadcasts it (no per-chunk re-materialization).
    iota = lax.broadcasted_iota(jnp.int32, (1, 1, Vp), 2)

    n_chunks = TI // chunk_i

    @pl.loop(0, n_chunks)
    def _(c):
        lo = pl.multiple_of(c * chunk_i, chunk_i)
        ri_i = ri_i_ref[0, pl.ds(lo, chunk_i), :]        # (chunk, 1)
        m_i = mask_i_ref[0, pl.ds(lo, chunk_i), :]       # (chunk, 1)

        # diff[i, j] = clamp(ri[b, j] - ri[b, i], -bins, bins) + bins + 1; masked pairs -> 0.
        d = jnp.clip(ri_j - ri_i, -bins, bins) + (bins + 1)     # (chunk, TJ)
        d = jnp.where((m_i * m_j) != 0, d, 0)

        # Exact one-hot gather on the MXU: compare stays int/bool, one cast to the
        # table dtype (bf16 on the fast path) right before the dot.
        onehot = (d[:, :, None] == iota).astype(emb.dtype)      # (chunk, TJ, Vp)
        g = jnp.dot(onehot.reshape(chunk_i * TJ, Vp), emb,
                    preferred_element_type=jnp.float32)         # (chunk*TJ, D)
        out_ref[:, pl.ds(lo, chunk_i), :, :] = (
            g.reshape(1, chunk_i, TJ, D).astype(out_ref.dtype))


def relative_position(residue_index, mask, embedding, bins, *,
                      out_dtype=None, tile_i=None, tile_j=None,
                      return_padded=False):
    """residue_index: (B, L) int, mask: (B, L) bool or None, embedding: (2*bins+2, D)."""
    B, L = residue_index.shape
    V, D = embedding.shape
    assert V == 2 * bins + 2
    out_dtype = jnp.dtype(embedding.dtype if out_dtype is None else out_dtype)

    # bf16 fast path: with a bf16 output the table can be held in bf16, so the
    # one-hot matmul is a single native bf16 MXU pass and output bytes halve.
    # Exact: the one-hot selects a single table row, so this is bit-identical to
    # gathering in f32 and casting.  (Only enabled when the OUTPUT is bf16.)
    table_dtype = jnp.bfloat16 if out_dtype == jnp.dtype(jnp.bfloat16) else embedding.dtype

    ri = residue_index.astype(jnp.int32)
    mk = jnp.ones((B, L), jnp.int32) if mask is None else mask.astype(jnp.int32)

    out_isz = out_dtype.itemsize
    tbl_isz = jnp.dtype(table_dtype).itemsize

    # ---- generation-aware tile selection ------------------------------------
    # Per-buffer output-tile budget (Pallas double-buffers the output block):
    # 32 MiB on v5e/v6e (128 MiB VMEM), 16 MiB on v7x (64 MiB VMEM).
    vmem_cap = _vmem_capacity_bytes()
    budget = (32 << 20) if vmem_cap >= (96 << 20) else (16 << 20)

    Lr = _round_up(L, 8)
    if tile_i is None and tile_j is None:
        if Lr * Lr * D * out_isz <= budget:
            tile_i = tile_j = Lr                     # single tile: no L padding, no slice
        else:
            tile_j = 256 if (256 * 128 * D * out_isz <= budget and Lr >= 256) else 128
            tile_i = 256 if (256 * tile_j * D * out_isz <= budget and Lr >= 256) else 128
    else:
        if tile_i is None:
            tile_i = 128
        if tile_j is None:
            tile_j = 128

    if tile_i == Lr and tile_j == Lr:
        Lp = Lr                                       # whole pair plane in one block
    else:
        tile_i = max(8, _round_up(tile_i, 8))
        tile_j = max(128, _round_up(tile_j, 128))     # lane-dim constraint of the col spec
        Lp = _round_up(L, math.lcm(tile_i, tile_j))

    if Lp != L:
        ri = jnp.pad(ri, ((0, 0), (0, Lp - L)))
        mk = jnp.pad(mk, ((0, 0), (0, Lp - L)))       # padded positions masked -> index 0

    # Row-side (B, Lp, 1) and column-side (B, 1, Lp) views: batch/row/col selection
    # happens purely in the index_maps, no in-kernel transpose or batch select.
    ri_i = ri.reshape(B, Lp, 1)
    ri_j = ri.reshape(B, 1, Lp)
    mk_i = mk.reshape(B, Lp, 1)
    mk_j = mk.reshape(B, 1, Lp)

    # Zero-pad the table to a 128-aligned K dim (padded rows are never selected).
    Vp = _round_up(V, 128)
    emb = jnp.zeros((Vp, D), table_dtype).at[:V, :].set(embedding.astype(table_dtype))

    # Larger chunks = fewer MXU issue/drain boundaries and fewer partial stores.
    chunk_i = next(c for c in (32, 16, 8) if tile_i % c == 0)

    grid = (B, Lp // tile_i, Lp // tile_j)

    vmem_est = (2 * tile_i * tile_j * D * out_isz             # double-buffered output tile
                + 2 * Vp * D * tbl_isz                        # resident table
                + 8 * (tile_i + tile_j) * 4                   # ri / mask slivers
                + chunk_i * tile_j * Vp * (4 + tbl_isz)       # compare mask + cast one-hot
                + chunk_i * tile_j * D * 4                    # f32 dot result
                + (4 << 20))                                  # headroom
    vmem_limit = int(min(max(vmem_est, 32 << 20), vmem_cap - (8 << 20)))

    cost = pl.CostEstimate(
        flops=2 * B * Lp * Lp * Vp * D,
        transcendentals=0,
        bytes_accessed=(B * Lp * Lp * D * out_isz             # output (dominant)
                        + 4 * B * Lp * 4                      # residue_index + mask, both views
                        + Vp * D * tbl_isz),                  # table
    )

    out = pl.pallas_call(
        functools.partial(_relpos_kernel, bins=bins, chunk_i=chunk_i),
        out_shape=jax.ShapeDtypeStruct((B, Lp, Lp, D), out_dtype),
        grid=grid,
        in_specs=[
            pl.BlockSpec((1, tile_i, 1), lambda b, i, j: (b, i, 0)),   # residue_index rows
            pl.BlockSpec((1, 1, tile_j), lambda b, i, j: (b, 0, j)),   # residue_index cols
            pl.BlockSpec((1, tile_i, 1), lambda b, i, j: (b, i, 0)),   # mask rows
            pl.BlockSpec((1, 1, tile_j), lambda b, i, j: (b, 0, j)),   # mask cols
            pl.BlockSpec((Vp, D), lambda b, i, j: (0, 0)),             # padded table (resident)
        ],
        out_specs=pl.BlockSpec((1, tile_i, tile_j, D), lambda b, i, j: (b, i, j, 0)),
        compiler_params=pltpu.CompilerParams(
            dimension_semantics=("parallel", "parallel", "parallel"),
            vmem_limit_bytes=vmem_limit,
        ),
        cost_estimate=cost,
    )(ri_i, ri_j, mk_i, mk_j, emb)

    if Lp != L and not return_padded:
        # NOTE: at real ESMFold sizes this slice is a full-tensor HBM copy; callers
        # that can consume the padded (B, Lp, Lp, D) layout should pass
        # return_padded=True (the default tile selection avoids padding when the
        # pair plane fits a single tile).
        out = out[:, :L, :L, :]
    return out


def relative_position_ref(residue_index, mask, embedding, bins):
    """Pure-JAX reference mirroring the PyTorch forward."""
    diff = residue_index[:, None, :] - residue_index[:, :, None]
    diff = jnp.clip(diff, -bins, bins) + bins + 1
    if mask is not None:
        pair_mask = mask[:, None, :] & mask[:, :, None]
        diff = jnp.where(pair_mask, diff, 0)
    return embedding[diff]


if __name__ == "__main__":
    key = jax.random.PRNGKey(0)
    k1, k2, k3, k4, k5, k6 = jax.random.split(key, 6)

    # --- primary small test (single-tile path) --------------------------------
    B, L, bins, D = 2, 8, 4, 32
    V = 2 * bins + 2
    residue_index = jax.random.randint(k1, (B, L), 0, 32, dtype=jnp.int32)
    mask = jax.random.bernoulli(k2, 0.8, (B, L))
    embedding = jax.random.normal(k3, (V, D), dtype=jnp.float32)

    out = jax.block_until_ready(relative_position(residue_index, mask, embedding, bins))
    ref = relative_position_ref(residue_index, mask, embedding, bins)
    assert out.shape == (B, L, L, D) and out.dtype == jnp.float32
    assert jnp.allclose(out, ref, atol=1e-5), "mismatch (small, masked)"

    out_nm = jax.block_until_ready(relative_position(residue_index, None, embedding, bins))
    ref_nm = relative_position_ref(residue_index, None, embedding, bins)
    assert jnp.allclose(out_nm, ref_nm, atol=1e-5), "mismatch (small, no mask)"

    # --- bf16 fast path --------------------------------------------------------
    out_bf = jax.block_until_ready(
        relative_position(residue_index, mask, embedding, bins, out_dtype=jnp.bfloat16))
    ref_bf = relative_position_ref(residue_index, mask,
                                   embedding.astype(jnp.bfloat16), bins)
    assert out_bf.dtype == jnp.bfloat16
    assert jnp.allclose(out_bf.astype(jnp.float32), ref_bf.astype(jnp.float32),
                        atol=1e-6), "mismatch (bf16 path)"

    # --- larger test: single-tile chunked loop (Lp == L, no padding/slice) -----
    B2, L2, bins2, D2 = 2, 200, 32, 32
    V2 = 2 * bins2 + 2
    residue_index2 = jax.random.randint(k4, (B2, L2), 0, 500, dtype=jnp.int32)
    mask2 = jax.random.bernoulli(k5, 0.9, (B2, L2))
    embedding2 = jax.random.normal(k6, (V2, D2), dtype=jnp.float32)

    out2 = jax.block_until_ready(relative_position(residue_index2, mask2, embedding2, bins2))
    ref2 = relative_position_ref(residue_index2, mask2, embedding2, bins2)
    assert out2.shape == (B2, L2, L2, D2)
    assert jnp.allclose(out2, ref2, atol=1e-5), "mismatch (single-tile chunked)"

    # --- multi-tile grid + L padding path (forced 128x128 tiles) ---------------
    out3 = jax.block_until_ready(
        relative_position(residue_index2, mask2, embedding2, bins2, tile_i=128, tile_j=128))
    assert out3.shape == (B2, L2, L2, D2)
    assert jnp.allclose(out3, ref2, atol=1e-5), "mismatch (multi-tile grid)"

    print("KERNEL_OK")
</pallas_src>

<mosaic_0001>
module attributes {stable_mosaic.version = 11 : i64} {
  func.func @_relpos_kernel(%arg0: i32, %arg1: i32, %arg2: i32, %arg3: memref<1x8x1xi32, #tpu.memory_space<vmem>>, %arg4: memref<1x1x8xi32, #tpu.memory_space<vmem>>, %arg5: memref<1x8x1xi32, #tpu.memory_space<vmem>>, %arg6: memref<1x1x8xi32, #tpu.memory_space<vmem>>, %arg7: memref<128x32xf32, #tpu.memory_space<vmem>>, %arg8: memref<1x8x8x32xf32, #tpu.memory_space<vmem>>) attributes {dimension_semantics = [#tpu.dimension_semantics<parallel>, #tpu.dimension_semantics<parallel>, #tpu.dimension_semantics<parallel>], iteration_bounds = array<i64: 2, 1, 1>, scalar_prefetch = 0 : i64, scratch_operands = 0 : i64, tpu.core_type = #tpu.core_type<tc>, window_params = [{transform_indices = @transform_0, window_bounds = array<i64: 1, 8, 1>}, {transform_indices = @transform_1, window_bounds = array<i64: 1, 1, 8>}, {transform_indices = @transform_2, window_bounds = array<i64: 1, 8, 1>}, {transform_indices = @transform_3, window_bounds = array<i64: 1, 1, 8>}, {pipeline_mode = #tpu.pipeline_mode<synchronous>, transform_indices = @transform_4, window_bounds = array<i64: 128, 32>}, {transform_indices = @transform_5, window_bounds = array<i64: 1, 8, 8, 32>}]} {
    %c0 = arith.constant 0 : index
    %c0_0 = arith.constant 0 : index
    %c0_1 = arith.constant 0 : index
    %0 = vector.load %arg4[%c0, %c0_0, %c0_1] : memref<1x1x8xi32, #tpu.memory_space<vmem>>, vector<1x1x8xi32>
    %1 = vector.shape_cast %0 : vector<1x1x8xi32> to vector<1x8xi32>
    %c0_2 = arith.constant 0 : index
    %c0_3 = arith.constant 0 : index
    %c0_4 = arith.constant 0 : index
    %2 = vector.load %arg6[%c0_2, %c0_3, %c0_4] : memref<1x1x8xi32, #tpu.memory_space<vmem>>, vector<1x1x8xi32>
    %3 = vector.shape_cast %2 : vector<1x1x8xi32> to vector<1x8xi32>
    %c0_5 = arith.constant 0 : index
    %c0_6 = arith.constant 0 : index
    %4 = vector.load %arg7[%c0_5, %c0_6] : memref<128x32xf32, #tpu.memory_space<vmem>>, vector<128x32xf32>
    %5 = tpu.iota {dimensions = array<i32: 2>} : vector<1x1x128xi32>
    %c0_i32 = arith.constant 0 : i32
    %c1_i32 = arith.constant 1 : i32
    %6 = arith.muli %c0_i32, %c1_i32 : i32
    %c0_i32_7 = arith.constant 0 : i32
    %7 = arith.addi %c0_i32_7, %6 : i32
    %c8_i32 = arith.constant 8 : i32
    %8 = arith.muli %7, %c8_i32 : i32
    %9 = tpu.assume_multiple %8, 8 : i32
    %c0_8 = arith.constant 0 : index
    %10 = arith.index_cast %9 : i32 to index
    %c0_9 = arith.constant 0 : index
    %11 = vector.load %arg3[%c0_8, %10, %c0_9] : memref<1x8x1xi32, #tpu.memory_space<vmem>>, vector<1x8x1xi32>
    %12 = vector.shape_cast %11 : vector<1x8x1xi32> to vector<8x1xi32>
    %c0_10 = arith.constant 0 : index
    %13 = arith.index_cast %9 : i32 to index
    %c0_11 = arith.constant 0 : index
    %14 = vector.load %arg5[%c0_10, %13, %c0_11] : memref<1x8x1xi32, #tpu.memory_space<vmem>>, vector<1x8x1xi32>
    %15 = vector.shape_cast %14 : vector<1x8x1xi32> to vector<8x1xi32>
    %16 = vector.broadcast %1 : vector<1x8xi32> to vector<8x8xi32>
    %17 = vector.broadcast %12 : vector<8x1xi32> to vector<8x8xi32>
    %18 = arith.subi %16, %17 : vector<8x8xi32>
    %c-4_i32 = arith.constant -4 : i32
    %c4_i32 = arith.constant 4 : i32
    %19 = vector.broadcast %c-4_i32 : i32 to vector<8x8xi32>
    %20 = arith.maxsi %19, %18 : vector<8x8xi32>
    %21 = vector.broadcast %c4_i32 : i32 to vector<8x8xi32>
    %22 = arith.minsi %21, %20 : vector<8x8xi32>
    %c5_i32 = arith.constant 5 : i32
    %23 = vector.broadcast %c5_i32 : i32 to vector<8x8xi32>
    %24 = arith.addi %22, %23 : vector<8x8xi32>
    %25 = vector.broadcast %15 : vector<8x1xi32> to vector<8x8xi32>
    %26 = vector.broadcast %3 : vector<1x8xi32> to vector<8x8xi32>
    %27 = arith.muli %25, %26 : vector<8x8xi32>
    %c0_i32_12 = arith.constant 0 : i32
    %28 = vector.broadcast %c0_i32_12 : i32 to vector<8x8xi32>
    %29 = arith.cmpi ne, %27, %28 : vector<8x8xi32>
    %c0_i32_13 = arith.constant 0 : i32
    %30 = vector.broadcast %c0_i32_13 : i32 to vector<8x8xi32>
    %31 = arith.select %29, %24, %30 : vector<8x8xi1>, vector<8x8xi32>
    %32 = vector.shape_cast %31 : vector<8x8xi32> to vector<8x8x1xi32>
    %33 = vector.broadcast %32 : vector<8x8x1xi32> to vector<8x8x128xi32>
    %34 = vector.broadcast %5 : vector<1x1x128xi32> to vector<8x8x128xi32>
    %35 = arith.cmpi eq, %33, %34 : vector<8x8x128xi32>
    %36 = arith.extui %35 : vector<8x8x128xi1> to vector<8x8x128xi32>
    %37 = arith.sitofp %36 : vector<8x8x128xi32> to vector<8x8x128xf32>
    %38 = vector.shape_cast %37 : vector<8x8x128xf32> to vector<64x128xf32>
    %cst = arith.constant dense<0.000000e+00> : vector<64x32xf32>
    %39 = tpu.matmul %38, %4, %cst {dimension_numbers = #tpu.dot_dimension_numbers<[1], [0], [0], [1], [0, 0, 1, 1], [], []>} : vector<64x128xf32>, vector<128x32xf32>, vector<64x32xf32> -> vector<64x32xf32>
    %40 = vector.shape_cast %39 : vector<64x32xf32> to vector<1x8x8x32xf32>
    %c0_14 = arith.constant 0 : index
    %41 = arith.index_cast %9 : i32 to index
    %c0_15 = arith.constant 0 : index
    %c0_16 = arith.constant 0 : index
    %42 = vector.load %arg8[%c0_14, %41, %c0_15, %c0_16] : memref<1x8x8x32xf32, #tpu.memory_space<vmem>>, vector<1x8x8x32xf32>
    tpu.vector_store %arg8[%c0_14, %41, %c0_15, %c0_16], %40 {strides = array<i32>} : memref<1x8x8x32xf32, #tpu.memory_space<vmem>>, vector<1x8x8x32xf32>,
    %c1_i32_17 = arith.constant 1 : i32
    return
  }
  func.func @transform_0(%arg0: i32, %arg1: i32, %arg2: i32) -> (i32, i32, i32) {
    %c0_i32 = arith.constant 0 : i32
    %c0_i32_0 = arith.constant 0 : i32
    return %arg0, %arg1, %c0_i32 : i32, i32, i32
  }
  func.func @transform_1(%arg0: i32, %arg1: i32, %arg2: i32) -> (i32, i32, i32) {
    %c0_i32 = arith.constant 0 : i32
    %c0_i32_0 = arith.constant 0 : i32
    return %arg0, %c0_i32, %arg2 : i32, i32, i32
  }
  func.func @transform_2(%arg0: i32, %arg1: i32, %arg2: i32) -> (i32, i32, i32) {
    %c0_i32 = arith.constant 0 : i32
    %c0_i32_0 = arith.constant 0 : i32
    return %arg0, %arg1, %c0_i32 : i32, i32, i32
  }
  func.func @transform_3(%arg0: i32, %arg1: i32, %arg2: i32) -> (i32, i32, i32) {
    %c0_i32 = arith.constant 0 : i32
    %c0_i32_0 = arith.constant 0 : i32
    return %arg0, %c0_i32, %arg2 : i32, i32, i32
  }
  func.func @transform_4(%arg0: i32, %arg1: i32, %arg2: i32) -> (i32, i32) {
    %c0_i32 = arith.constant 0 : i32
    %c0_i32_0 = arith.constant 0 : i32
    %c0_i32_1 = arith.constant 0 : i32
    return %c0_i32, %c0_i32_0 : i32, i32
  }
  func.func @transform_5(%arg0: i32, %arg1: i32, %arg2: i32) -> (i32, i32, i32, i32) {
    %c0_i32 = arith.constant 0 : i32
    %c0_i32_0 = arith.constant 0 : i32
    return %arg0, %arg1, %arg2, %c0_i32 : i32, i32, i32, i32
  }
}

</mosaic_0001>

<bundles_post_ra>
// kernel: tpu_custom_call.1
= control target key start
LH: loop header
LB: loop body
LE: loop exit
PB: predicated region body
PF: predicated region fallthrough
CT: control target
= control target key end

     0   :  { %10 = vsyncpa [#allocation3], 0  ;;  %s1073_s0 = inlined_call_operand.vmem [shape: s32[2,8,1], index: 0, kind: input, shape index: {}]   ;;  %s1074_s1 = inlined_call_operand.vmem [shape: s32[2,1,8], index: 1, kind: input, shape index: {}]   ;;  %s1075_s2 = inlined_call_operand.vmem [shape: s32[2,8,1], index: 2, kind: input, shape index: {}]   ;;  %s1076_s3 = inlined_call_operand.vmem [shape: s32[2,1,8], index: 3, kind: input, shape index: {}]   ;;  %s1077_s4 = inlined_call_operand.vmem [shape: f32[128,32], index: 4, kind: input, shape index: {}]   ;;  %s1078_s5 = inlined_call_operand.hbm [shape: f32[2,8,8,32], index: 5, kind: output, shape index: {}]  }
   0x1   :  { %12 = vsyncpa [#allocation3 + $0x1], 0  ;;  %s899_s18 = smov 0   ;;  %s901_s19 = smov 0  }
   0x2   :  { %s903_s20 = smov 0   ;;  %s905_s21 = smov 0  }
   0x3   :  { %s907_s22 = smov 0   ;;  %s909_s23 = smov 0  }
   0x4 LB: > { %s642_s24 = sadd.s32 4294967295, %s863_s23   ;;  %s643_s25 = sadd.s32 4294967294, %s863_s23   ;;  %s863_s23 = sphi %s909_s23, %s18_s23   ;;  %s859_s22 = sphi %s907_s22, %s1085_s22   ;;  %s855_s21 = sphi %s905_s21, %s1084_s21   ;;  %s851_s20 = sphi %s903_s20, %s1083_s20   ;;  %s847_s19 = sphi %s901_s19, %s1082_s19   ;;  %s843_s18 = sphi %s899_s18, %s1081_s18  }
   0x5   : > { %s37_s26 = sadd.s32 1, %s859_s22  ;;  %s181_s27 = sadd.s32 1, %s851_s20 }
   0x6   : > { %p39_p0 = scmp.ge.s32.totalorder %s37_s26, 2  ;;  %p191_p1 = scmp.ne.s32.totalorder %s851_s20, %s847_s19 }
   0x7   : > { %p192_p2 = scmp.eq.s32.totalorder %s642_s24, 1  ;;  %p197_p3 = scmp.ne.s32.totalorder %s847_s19, %s843_s18 }
   0x8   : > { %s1087_s26 = smov (%p39_p0, %s37_s26), 0  ;;  %p198_p5 = scmp.eq.s32.totalorder %s643_s25, 1 }
   0x9   : > { %p939_p4 = por %p192_p2, %p191_p1  ;;  %s174_s29 = ssub.s32 %s859_s22, %s1087_s26 }
   0xa   : > { %p646_p6 = scmp.ge.s32.totalorder %s863_s23, 1  ;;  %p179_p7 = scmp.eq.s32.totalorder %s174_s29, 0 }
   0xb   : > { %p946_p8 = por %p198_p5, %p197_p3  ;;  %p257_p9 = scmp.lt.s32.totalorder %s863_s23, 3 }
   0xc   : > { %s952_s6 = scalar_select %p179_p7, %s851_s20, %s181_s27  }
   0xd   : > { %p258_p10 = pnand %p646_p6, %p257_p9 }
   0xe   : > { %p306_p11 = scmp.lt.s32.totalorder (!%p258_p10), %s855_s21, 1  ;;  %s805_s29 = scalar_lea.hbm (!%p258_p10), %s1078_s5, 128 }
   0xf   : > { %261 = sbr.rel (%p258_p10) target bundleno = 424 (0x1a8), region = 40 }
  0x14   : > { %v865_v0 = vmov 0   ;;  %s307_s7 = scalar_select %p306_p11, %s855_s21, 1  ;;  %v351_v3 = vlaneseq  ;;  %v350_v11 = vld [vmem:[%s1077_s4 + $0x78] sm:$0xff]  ;;  %v349_v12 = vld [vmem:[%s1077_s4 + $0x70] sm:$0xff]  ;;  %v348_v15 = vld [vmem:[%s1077_s4 + $0x68] sm:$0xff]  ;;  %v866_v41 = vmov 1.0  }
  0x15   : > { %779 = vset.pattern.permute.xlu0 %v865_v0  ;;  %452 = vmatpush.msra.mxu0 %v350_v11  ;;  %v347_v17 = vld [vmem:[%s1077_s4 + $0x60] sm:$0xff]  ;;  %v346_v22 = vld [vmem:[%s1077_s4 + $0x58] sm:$0xff]  ;;  %v345_v23 = vld [vmem:[%s1077_s4 + $0x50] sm:$0xff]  ;;  %vm495_vm11 = vcmask 261120  }
  0x16   : > { %s648_s8 = sshll.u32 %s307_s7, 3  ;;  %s318_s11 = scalar_lea.vmem %s1074_s1, %s307_s7  ;;  %v374_v4 = vshrl.u32 %v351_v3, 7  ;;  %672 = vmatpush.msra.mxu1 %v350_v11  ;;  %673 = vmatpush.msra.mxu2 %v350_v11  ;;  %v344_v24 = vld [vmem:[%s1077_s4 + $0x48] sm:$0xff]  ;;  %v343_v25 = vld [vmem:[%s1077_s4 + $0x40] sm:$0xff]  ;;  %v342_v27 = vld [vmem:[%s1077_s4 + $0x38] sm:$0xff]  ;;  %v352_v39 = vand.u32 127, %v351_v3 }
  0x17   : > { %s312_s14 = scalar_lea.vmem %s1073_s0, %s648_s8  ;;  %s331_s17 = scalar_lea.vmem %s1076_s3, %s307_s7  ;;  %v783_v5 = vld [vmem:[%s318_s11] ss:$0 sm:$0xff]  ;;  %674 = vmatpush.msra.mxu3 %v350_v11  ;;  %453 = vmatpush.msra.mxu0 %v349_v12  ;;  %v341_v29 = vld [vmem:[%s1077_s4 + $0x30] sm:$0xff]  ;;  %v340_v30 = vld [vmem:[%s1077_s4 + $0x28] sm:$0xff] }
  0x18   : > { %v353_v1 = vld [vmem:[%s312_s14] sm:$0xff]  ;;  %s325_s27 = scalar_lea.vmem %s1075_s2, %s648_s8  ;;  %781 = vset.pattern.permute.xlu2 %v374_v4  ;;  %780 = vset.pattern.permute.xlu1 %v374_v4  ;;  %v338_v33 = vld [vmem:[%s1077_s4 + $0x18] sm:$0xff]  ;;  %v337_v35 = vld [vmem:[%s1077_s4 + $0x10] sm:$0xff]  ;;  %s303_s8 = sand.u32 1, %s847_s19  }
  0x19   : > { %357 = vperm.xlu0 %779, %v353_v1   ;;  %v354_v2 = vld [vmem:[%s325_s27] sm:$0xff]  ;;  %675 = vmatpush.msra.mxu1 %v349_v12  ;;  %v336_v36 = vld [vmem:[%s1077_s4 + $0x8] sm:$0xff]  ;;  %s647_s9 = sshll.u32 %s303_s8, 6  ;;  %s671_s11 = sshll.u32 %s855_s21, 6 }
  0x1a   : > { %v784_v9 = vld [vmem:[%s331_s17] ss:$0 sm:$0xff]  ;;  %676 = vmatpush.msra.mxu2 %v349_v12  ;;  %677 = vmatpush.msra.mxu3 %v349_v12  ;;  %s305_s10 = scalar_lea.vmem [#allocation2], %s647_s9  ;;  %s519_s14 = scalar_lea.hbm %s1078_s5, %s671_s11 }
  0x1b   : > { %454 = vmatpush.msra.mxu0 %v348_v15  ;;  %678 = vmatpush.msra.mxu1 %v348_v15  ;;  %v339_v31 = vld [vmem:[%s1077_s4 + $0x20] sm:$0xff]  ;;  %s520_s15 = sshll.u32 %s305_s10, 4  ;;  %s522_s16 = sshll.u32 %s519_s14, 4  ;;  %s521_s15 = int_to_ptr.vmem [resolvable:$true] %s520_s15  ;;  %s523_s16 = int_to_ptr.hbm [resolvable:$true] %s522_s16 }
  0x1c   : > { %679 = vmatpush.msra.mxu2 %v348_v15  ;;  %680 = vmatpush.msra.mxu3 %v348_v15  ;;  %v335_v38 = vld [vmem:[%s1077_s4] sm:$0xff]  ;;  %s505_s21 = scalar_lea.sflag [#allocation3], %s303_s8  ;;  %s799_s17 = sshra.s32 %s523_s16, 4  ;;  %s800_s17 = int_to_ptr.hbm [resolvable:$true] %s799_s17 }
  0x1d   : > { %455 = vmatpush.msra.mxu0 %v347_v17  ;;  %681 = vmatpush.msra.mxu1 %v347_v17  ;;  %s801_s24 = scalar_lea.hbm %s800_s17, 64  ;;  %p806_p1 = scmp.lt.s32.totalorder %s800_s17, %s1078_s5 }
  0x1e   : > { %682 = vmatpush.msra.mxu2 %v347_v17  ;;  %683 = vmatpush.msra.mxu3 %v347_v17  ;;  %p802_p12 = scmp.ne.s32.totalorder %s800_s17, %s801_s24  ;;  %p807_p2 = scmp.lt.s32.totalorder %s805_s29, %s801_s24 }
  0x1f   : > { %456 = vmatpush.msra.mxu0 %v346_v22  ;;  %684 = vmatpush.msra.mxu1 %v346_v22 }
  0x20   : > { %685 = vmatpush.msra.mxu2 %v346_v22  ;;  %686 = vmatpush.msra.mxu3 %v346_v22  ;;  %p803_p13 = pnand %p802_p12, %p939_p4  ;;  %p808_p3 = por %p807_p2, %p806_p1 }
  0x21   : > { %366 = vperm.xlu0 %779, %v354_v2   ;;  %457 = vmatpush.msra.mxu0 %v345_v23 }
  0x22   : > { %687 = vmatpush.msra.mxu1 %v345_v23  ;;  %688 = vmatpush.msra.mxu2 %v345_v23  ;;  %p804_p0 = pneg %p803_p13 }
  0x23   : > { %458 = vmatpush.msra.mxu0 %v344_v24  ;;  %689 = vmatpush.msra.mxu3 %v345_v23 }
  0x24   : > { %690 = vmatpush.msra.mxu1 %v344_v24  ;;  %691 = vmatpush.msra.mxu2 %v344_v24  ;;  %p809_p5 = pnand %p808_p3, %p804_p0 }
  0x25   : > { %459 = vmatpush.msra.mxu0 %v343_v25  ;;  %692 = vmatpush.msra.mxu3 %v344_v24 }
  0x26   : > { %693 = vmatpush.msra.mxu1 %v343_v25  ;;  %694 = vmatpush.msra.mxu2 %v343_v25 }
  0x27   : > { %460 = vmatpush.msra.mxu0 %v342_v27  ;;  %695 = vmatpush.msra.mxu3 %v343_v25 }
  0x28   : > { %696 = vmatpush.msra.mxu1 %v342_v27  ;;  %697 = vmatpush.msra.mxu2 %v342_v27 }
  0x29   : > { %782 = vset.pattern.permute.xlu0 %v374_v4  ;;  %461 = vmatpush.msra.mxu0 %v341_v29 }
  0x2a   : > { %699 = vmatpush.msra.mxu1 %v341_v29  ;;  %698 = vmatpush.msra.mxu3 %v342_v27 }
  0x2b   : > { %462 = vmatpush.msra.mxu0 %v340_v30  ;;  %700 = vmatpush.msra.mxu2 %v341_v29 }
  0x2c   : > { %702 = vmatpush.msra.mxu1 %v340_v30  ;;  %701 = vmatpush.msra.mxu3 %v341_v29 }
  0x2d   : > { %463 = vmatpush.msra.mxu0 %v339_v31  ;;  %703 = vmatpush.msra.mxu2 %v340_v30 }
  0x2e   : > { %705 = vmatpush.msra.mxu1 %v339_v31  ;;  %704 = vmatpush.msra.mxu3 %v340_v30 }
  0x2f   : > { %464 = vmatpush.msra.mxu0 %v338_v33  ;;  %706 = vmatpush.msra.mxu2 %v339_v31 }
  0x30   : > { %708 = vmatpush.msra.mxu1 %v338_v33  ;;  %707 = vmatpush.msra.mxu3 %v339_v31 }
  0x31   : > { %465 = vmatpush.msra.mxu0 %v337_v35  ;;  %709 = vmatpush.msra.mxu2 %v338_v33 }
  0x32   : > { %711 = vmatpush.msra.mxu1 %v337_v35  ;;  %710 = vmatpush.msra.mxu3 %v338_v33 }
  0x33   : > { %466 = vmatpush.msra.mxu0 %v336_v36  ;;  %712 = vmatpush.msra.mxu2 %v337_v35 }
  0x34   : > { %714 = vmatpush.msra.mxu1 %v336_v36  ;;  %713 = vmatpush.msra.mxu3 %v337_v35 }
  0x35   : > { %715 = vmatpush.msra.mxu2 %v336_v36  ;;  %467 = vmatpush.msra.mxu0 %v335_v38 }
  0x36   : > { %716 = vmatpush.msra.mxu3 %v336_v36  ;;  %717 = vmatpush.msra.mxu1 %v335_v38 }
  0x37   : > { %718 = vmatpush.msra.mxu2 %v335_v38 }
  0x38   : > { %719 = vmatpush.msra.mxu3 %v335_v38 }
  0x8b   : > { %v358_v6 = vpop.permute.xlu0 %357 }
  0x8c   : > { %v359_v7 = vsub.s32 %v783_v5, %v358_v6 }
  0x8e   : > { %vm360_vm0 = vcmp.gt.s32.totalorder %v359_v7, 4294967292 }
  0x8f   : > { %v361_v8 = vsel %vm360_vm0, %v359_v7, 4294967292 }
  0x90   : > { %vm362_vm1 = vcmp.lt.s32.totalorder %v361_v8, 4 }
  0x91   : > { %v363_v10 = vsel %vm362_vm1, %v361_v8, 4 }
  0x92   : > { %v364_v16 = vadd.s32 5, %v363_v10 }
  0x93   : > { %v367_v13 = vpop.permute.xlu0 %366 }
  0x94   : > { %v369_v14 = vmul.u32 %v784_v9, %v367_v13 }
  0x96   : > { %vm370_vm2 = vcmp.ne.s32.totalorder %v369_v14, 0 }
  0x97   : > { %v981_v18 = vsel %vm370_vm2, %v364_v16, 0 }
  0x98   : > { %v407_v19 = vperm.slane %v981_v18, 5  ;;  %v400_v20 = vperm.slane %v981_v18, 4  ;;  %v372_v21 = vperm.slane %v981_v18, 0  ;;  %v414_v26 = vperm.slane %v981_v18, 6 }
  0x99   : > { %v386_v28 = vperm.slane %v981_v18, 2  ;;  %v421_v32 = vperm.slane %v981_v18, 7  ;;  %v379_v34 = vperm.slane %v981_v18, 1  ;;  %v393_v37 = vperm.slane %v981_v18, 3 }
  0x9a   : > { %412 = vperm.xlu0 %782, %v407_v19   ;;  %405 = vperm.xlu1 %780, %v400_v20  }
  0x9b   : > { %377 = vperm.xlu2 %781, %v372_v21  }
  0xa2   : > { %419 = vperm.xlu1 %780, %v414_v26  }
  0xa3   : > { %391 = vperm.xlu2 %781, %v386_v28  }
  0xaa   : > { %426 = vperm.xlu1 %780, %v421_v32  }
  0xab   : > { %384 = vperm.xlu2 %781, %v379_v34  }
  0xb2   : > { %398 = vperm.xlu1 %780, %v393_v37  }
  0xf5   : > { %v378_v40 = vpop.permute.xlu2 %377 }
  0xf6   : > { %vm428_vm3 = vcmp.eq.s32.totalorder %v378_v40, %v352_v39 }
  0xf7   : > { %658 = vmatmul.msk.f32.vlgmr.msra.gmra.mxu0 %vm428_vm3, %v866_v41 }
  0xfd   : > { %v392_v42 = vpop.permute.xlu2 %391 }
  0xfe   : > { %vm430_vm4 = vcmp.eq.s32.totalorder %v392_v42, %v352_v39 }
  0xff   : > { %660 = vmatmul.msk.f32.vlgmr.msra.gmra.mxu1 %vm430_vm4, %v866_v41 }
 0x105   : > { %v385_v43 = vpop.permute.xlu2 %384 }
 0x106   : > { %vm429_vm5 = vcmp.eq.s32.totalorder %v385_v43, %v352_v39 }
 0x107   : > { %659 = vmatmul.msk.f32.gmra.mxu0 %vm429_vm5, %v866_v41 }
 0x10c   : > { %v406_v44 = vpop.permute.xlu1 %405  ;;  %v413_v45 = vpop.permute.xlu0 %412 }
 0x10d   : > { %vm432_vm6 = vcmp.eq.s32.totalorder %v406_v44, %v352_v39  ;;  %vm433_vm7 = vcmp.eq.s32.totalorder %v413_v45, %v352_v39 }
 0x10e   : > { %662 = vmatmul.msk.f32.vlgmr.msra.gmra.mxu2 %vm432_vm6, %v866_v41 }
 0x114   : > { %v420_v46 = vpop.permute.xlu1 %419 }
 0x115   : > { %vm434_vm8 = vcmp.eq.s32.totalorder %v420_v46, %v352_v39 }
 0x116   : > { %663 = vmatmul.msk.f32.gmra.mxu2 %vm433_vm7, %v866_v41  ;;  %664 = vmatmul.msk.f32.vlgmr.msra.gmra.mxu3 %vm434_vm8, %v866_v41 }
 0x11c   : > { %v427_v47 = vpop.permute.xlu1 %426 }
 0x11d   : > { %vm435_vm9 = vcmp.eq.s32.totalorder %v427_v47, %v352_v39 }
 0x11e   : > { %665 = vmatmul.msk.f32.gmra.mxu3 %vm435_vm9, %v866_v41 }
 0x124   : > { %v399_v48 = vpop.permute.xlu1 %398 }
 0x125   : > { %vm431_vm10 = vcmp.eq.s32.totalorder %v399_v48, %v352_v39 }
 0x126   : > { %661 = vmatmul.msk.f32.gmra.mxu1 %vm431_vm10, %v866_v41 }
 0x174   : > { %v469_v49 = vpop.f32.mrf.mxu0 }
 0x175   : > { %496 = vst.msk [vmem:[%s305_s10] sm:$0xff] %vm495_vm11, %v469_v49 }
 0x17c   : > { %v475_v50 = vpop.f32.mrf.mxu1 }
 0x17d   : > { %498 = vst.msk [vmem:[%s305_s10 + $0x10] sm:$0xff] %vm495_vm11, %v475_v50 }
 0x184   : > { %v472_v51 = vpop.f32.mrf.mxu0 }
 0x185   : > { %497 = vst.msk [vmem:[%s305_s10 + $0x8] sm:$0xff] %vm495_vm11, %v472_v51 }
 0x191   : > { %v481_v52 = vpop.f32.mrf.mxu2 }
 0x192   : > { %500 = vst.msk [vmem:[%s305_s10 + $0x20] sm:$0xff] %vm495_vm11, %v481_v52 }
 0x199   : > { %v484_v53 = vpop.f32.mrf.mxu2  ;;  %v487_v54 = vpop.f32.mrf.mxu3 }
 0x19a   : > { %501 = vst.msk [vmem:[%s305_s10 + $0x28] sm:$0xff] %vm495_vm11, %v484_v53 }
 0x19b   : > { %502 = vst.msk [vmem:[%s305_s10 + $0x30] sm:$0xff] %vm495_vm11, %v487_v54 }
 0x1a1   : > { %v490_v55 = vpop.f32.mrf.mxu3 }
 0x1a2   : > { %503 = vst.msk [vmem:[%s305_s10 + $0x38] sm:$0xff] %vm495_vm11, %v490_v55 }
 0x1a3   : > { %v478_v56 = vpop.f32.mrf.mxu1 }
 0x1a4   : > { %499 = vst.msk [vmem:[%s305_s10 + $0x18] sm:$0xff] %vm495_vm11, %v478_v56 }
 0x1a5   : > { %812 = shalt.err (!%p809_p5)
}
 0x1a6   : > { %s867_s8 = smov 128   ;;  %s868_s10 = smov 8  }
 0x1a7   : > { %720 = dma.vmem_to_hbm [thread:$0]  (%p939_p4), %s521_s15, 1024, %s523_s16, %s505_s21, %s867_s8, %s867_s8, %s868_s10  }
 0x1a8 PF: > { %p726_p6 = scmp.ge.s32.totalorder %s863_s23, 2  ;;  %s537_s11 = sand.u32 1, %s843_s18  }
 0x1a9   : > { %s538_s12 = scalar_lea.sflag [#allocation3], %s537_s11 }
 0x1aa   : > { %p723_p7 = pnand %p726_p6, %p946_p8 }
 0x1ac   : > { %p724_p9 = pneg %p723_p7 }
 0x1ae   : > { %838 = dma.done.wait (%p724_p9), %s538_s12, 1024  }
 0x1af   : > { %840 = vsyncadd (%p724_p9), %s538_s12, 4294966272  ;;  %s18_s23 = sadd.s32 1, %s863_s23   ;;  %s1081_s18 = smov %s847_s19 }
 0x1b0   : > { %p15_p10 = scmp.ge.s32.totalorder %s18_s23, 4   ;;  %s1082_s19 = smov %s851_s20 }
 0x1b1   : > { %s1083_s20 = smov %s952_s6  ;;  %s1084_s21 = smov %s859_s22 }
 0x1b2   : > { %s1085_s22 = smov %s1087_s26  ;;  %17 = sbr.rel (!%p15_p10) target bundleno = 4 (0x4), region = 85 }
 0x1b7   :  { %544 = vsyncpa [#allocation3], 1 }
 0x1b8   :  { %546 = vsyncpa [#allocation3 + $0x1], 1 }

</bundles_post_ra>
